<compile_context>
chip_gen: v7x
topology: tpu7x:2x2x1
jax: 0.10.0
libtpu: 0.0.40
codegen_flags: <defaults>
</compile_context>

<pallas_src>
import jax
import jax.numpy as jnp
from jax import lax
from jax.experimental import pallas as pl
from jax.experimental.pallas import tpu as pltpu


# ------------------------------ fused kernel --------------------------------

def _age_classify_kernel(x_ref, w6_ref, b6_ref, w7_ref, b7_ref, w8_ref, b8_ref,
                         o_ref):
    f32 = jnp.float32
    # fc6 with conv1/conv2/flatten and BatchNorm folded in (+ ReLU).
    h6 = jnp.maximum(
        jnp.dot(x_ref[...], w6_ref[...], preferred_element_type=f32)
        + b6_ref[...], 0.0)
    # fc7 (+ folded BN + ReLU).
    h7 = jnp.maximum(
        jnp.dot(h6, w7_ref[...], preferred_element_type=f32) + b7_ref[...],
        0.0)
    # fc8, zero-padded to 128 output lanes -> single unmasked lane-dense store.
    o_ref[...] = (jnp.dot(h7, w8_ref[...], preferred_element_type=f32)
                  + b8_ref[...])


# ------------------------------- parameters ---------------------------------

def init_params(key, n_classes=3):
    """PyTorch-layout parameters for the layers the original forward uses."""
    keys = jax.random.split(key, 10)

    def u(k, shape, fan_in):
        bound = 1.0 / (fan_in ** 0.5)
        return jax.random.uniform(k, shape, jnp.float32, -bound, bound)

    p = {}
    p["conv1_w"] = u(keys[0], (24, 1, 5, 5), 1 * 5 * 5)
    p["conv1_b"] = u(keys[1], (24,), 1 * 5 * 5)
    p["conv2_w"] = u(keys[2], (64, 24, 5, 5), 24 * 5 * 5)
    p["conv2_b"] = u(keys[3], (64,), 24 * 5 * 5)
    p["fc6_w"] = u(keys[4], (256, 960), 960)            # Linear(64*15, 128*2)
    p["fc6_b"] = u(keys[5], (256,), 960)
    p["fc6_gamma"] = jnp.ones((256,), jnp.float32)       # BatchNorm1d(256)
    p["fc6_beta"] = jnp.zeros((256,), jnp.float32)
    p["fc6_mean"] = jnp.zeros((256,), jnp.float32)       # running stats (eval)
    p["fc6_var"] = jnp.ones((256,), jnp.float32)
    p["fc7_w"] = u(keys[6], (128, 256), 256)             # Linear(256, 128)
    p["fc7_b"] = u(keys[7], (128,), 256)
    p["fc7_gamma"] = jnp.ones((128,), jnp.float32)       # BatchNorm1d(128)
    p["fc7_beta"] = jnp.zeros((128,), jnp.float32)
    p["fc7_mean"] = jnp.zeros((128,), jnp.float32)
    p["fc7_var"] = jnp.ones((128,), jnp.float32)
    p["fc8_w"] = u(keys[8], (n_classes, 128), 128)       # Linear(128, nClasses)
    p["fc8_b"] = u(keys[9], (n_classes,), 128)
    return p


def _front_affine(p, x_flat, use_bias):
    """conv1 -> conv2 -> NCHW flatten -> fc6 Linear, optionally without biases.

    Used only at parameter-prep time (off the hot path) to extract the exact
    affine map of the network front end.
    """
    def maybe(b):
        return b if use_bias else jnp.zeros_like(b)

    x = x_flat.reshape(-1, 1, 11, 13)
    h1 = lax.conv_general_dilated(
        x, p["conv1_w"], window_strides=(1, 1), padding="VALID",
        dimension_numbers=("NCHW", "OIHW", "NCHW"))
    h1 = h1 + maybe(p["conv1_b"])[None, :, None, None]
    h2 = lax.conv_general_dilated(
        h1, p["conv2_w"], window_strides=(1, 1), padding="VALID",
        dimension_numbers=("NCHW", "OIHW", "NCHW"))
    h2 = h2 + maybe(p["conv2_b"])[None, :, None, None]
    flat = h2.reshape(h2.shape[0], -1)       # NCHW flatten: idx = c*15 + oh*5+ow
    return flat @ p["fc6_w"].T + maybe(p["fc6_b"])


def prepare_params(p, eps=1e-5, out_pad=128):
    """One-time offline fold: front-end affine map + BN folding + fc8 padding."""
    def bn_fold(prefix):
        scale = p[prefix + "_gamma"] / jnp.sqrt(p[prefix + "_var"] + eps)
        shift = p[prefix + "_beta"] - p[prefix + "_mean"] * scale
        return scale, shift

    # conv1 + conv2 + flatten + fc6 linear are affine with no nonlinearity in
    # between, so probe the exact map with the 143 input basis vectors
    # (linear part, biases off) and the zero input (constant part, biases on).
    s6, sh6 = bn_fold("fc6")
    w6_lin = _front_affine(p, jnp.eye(143, dtype=jnp.float32), False)  # (143,256)
    b6_aff = _front_affine(p, jnp.zeros((1, 143), jnp.float32), True)[0]
    w6 = w6_lin * s6[None, :]
    b6 = (b6_aff * s6 + sh6).reshape(1, 256)

    s7, sh7 = bn_fold("fc7")
    w7 = p["fc7_w"].T * s7[None, :]                       # (256, 128)
    b7 = (p["fc7_b"] * s7 + sh7).reshape(1, 128)

    # fc8 zero-padded to 128 output lanes for a lane-dense, unmasked store.
    n_classes = p["fc8_w"].shape[0]
    w8 = jnp.zeros((128, out_pad), jnp.float32).at[:, :n_classes].set(
        p["fc8_w"].T)
    b8 = jnp.zeros((1, out_pad), jnp.float32).at[0, :n_classes].set(p["fc8_b"])

    return {"w6": w6, "b6": b6, "w7": w7, "b7": b7, "w8": w8, "b8": b8}


# --------------------------------- forward ----------------------------------

def _full_spec(a):
    zeros = (0,) * a.ndim
    return pl.BlockSpec(a.shape, lambda i: zeros)


def age_classify_forward(prep, x_nchw, n_classes=3, block_b=None):
    """Single fused pallas_call; returns (B, n_classes) logits."""
    B, C, H, W = x_nchw.shape
    assert (C, H, W) == (1, 11, 13), "expected (B, 1, 11, 13) input"
    # Lane-dense input: pure metadata-only reshape, feature dim goes to lanes.
    x = x_nchw.reshape(B, C * H * W)                      # (B, 143)

    # TODO(synk): the original forward calls self.conv3/conv4/conv5 between
    # conv2 and the flatten; conv4/conv5 are never defined in __init__ and
    # conv3 (Conv1d 256->128) is shape-incompatible with the 4-D 64-channel
    # tensor, so they are skipped.  bilstm / mp / fc are defined but unused.
    # `opt.batch_size` in the original view() is replaced by the actual batch.

    if block_b is None:
        tb = B if B <= 512 else 512        # latency: one step; throughput: %8==0
    else:
        tb = block_b
    tb = min(tb, B)
    grid = (pl.cdiv(B, tb),)

    weights = (prep["w6"], prep["b6"], prep["w7"], prep["b7"],
               prep["w8"], prep["b8"])

    out_padded = pl.pallas_call(
        _age_classify_kernel,
        out_shape=jax.ShapeDtypeStruct((B, 128), jnp.float32),
        grid=grid,
        in_specs=[pl.BlockSpec((tb, C * H * W), lambda i: (i, 0))]
                 + [_full_spec(a) for a in weights],
        out_specs=pl.BlockSpec((tb, 128), lambda i: (i, 0)),
        compiler_params=pltpu.CompilerParams(
            dimension_semantics=("parallel",)),
    )(x, *weights)
    return out_padded[:, :n_classes]


# ---------------------------- pure-JAX reference -----------------------------

def reference_forward(p, x_nchw, eps=1e-5):
    """Unfused eval-mode reference (conv1 -> conv2 -> flatten -> fc6/7/8)."""
    def bn(v, prefix):
        scale = p[prefix + "_gamma"] / jnp.sqrt(p[prefix + "_var"] + eps)
        return (v - p[prefix + "_mean"]) * scale + p[prefix + "_beta"]

    h1 = lax.conv_general_dilated(
        x_nchw, p["conv1_w"], (1, 1), "VALID",
        dimension_numbers=("NCHW", "OIHW", "NCHW")) + p["conv1_b"][None, :, None, None]
    h2 = lax.conv_general_dilated(
        h1, p["conv2_w"], (1, 1), "VALID",
        dimension_numbers=("NCHW", "OIHW", "NCHW")) + p["conv2_b"][None, :, None, None]
    flat = h2.reshape(h2.shape[0], -1)
    h6 = jax.nn.relu(bn(flat @ p["fc6_w"].T + p["fc6_b"], "fc6"))
    h7 = jax.nn.relu(bn(h6 @ p["fc7_w"].T + p["fc7_b"], "fc7"))
    return h7 @ p["fc8_w"].T + p["fc8_b"]


# ----------------------------------- main ------------------------------------

if __name__ == "__main__":
    key = jax.random.PRNGKey(0)
    k_param, k_data = jax.random.split(key)

    params = init_params(k_param, n_classes=3)
    prep = prepare_params(params)           # one-time weight fold, off hot path

    batch = 2
    x = jax.random.normal(k_data, (batch, 1, 11, 13), dtype=jnp.float32)

    fwd = jax.jit(age_classify_forward)
    out = jax.block_until_ready(fwd(prep, x))
    assert out.shape == (batch, 3), out.shape
    assert bool(jnp.all(jnp.isfinite(out)))

    # Validate the affine fold against the unfused reference (reassociation of
    # f32 accumulation -> small tolerance).
    ref = reference_forward(params, x)
    max_err = float(jnp.max(jnp.abs(out - ref)))
    assert bool(jnp.allclose(out, ref, atol=1e-3, rtol=1e-3)), max_err

    print("KERNEL_OK")
</pallas_src>

<mosaic_0001>
module attributes {stable_mosaic.version = 11 : i64} {
  func.func @_age_classify_kernel(%arg0: i32, %arg1: memref<2x143xf32, #tpu.memory_space<vmem>>, %arg2: memref<143x256xf32, #tpu.memory_space<vmem>>, %arg3: memref<1x256xf32, #tpu.memory_space<vmem>>, %arg4: memref<256x128xf32, #tpu.memory_space<vmem>>, %arg5: memref<1x128xf32, #tpu.memory_space<vmem>>, %arg6: memref<128x128xf32, #tpu.memory_space<vmem>>, %arg7: memref<1x128xf32, #tpu.memory_space<vmem>>, %arg8: memref<2x128xf32, #tpu.memory_space<vmem>>) attributes {dimension_semantics = [#tpu.dimension_semantics<parallel>], iteration_bounds = array<i64: 1>, scalar_prefetch = 0 : i64, scratch_operands = 0 : i64, tpu.core_type = #tpu.core_type<tc>, window_params = [{transform_indices = @transform_0, window_bounds = array<i64: 2, 143>}, {pipeline_mode = #tpu.pipeline_mode<synchronous>, transform_indices = @transform_1, window_bounds = array<i64: 143, 256>}, {pipeline_mode = #tpu.pipeline_mode<synchronous>, transform_indices = @transform_2, window_bounds = array<i64: 1, 256>}, {pipeline_mode = #tpu.pipeline_mode<synchronous>, transform_indices = @transform_3, window_bounds = array<i64: 256, 128>}, {pipeline_mode = #tpu.pipeline_mode<synchronous>, transform_indices = @transform_4, window_bounds = array<i64: 1, 128>}, {pipeline_mode = #tpu.pipeline_mode<synchronous>, transform_indices = @transform_5, window_bounds = array<i64: 128, 128>}, {pipeline_mode = #tpu.pipeline_mode<synchronous>, transform_indices = @transform_6, window_bounds = array<i64: 1, 128>}, {transform_indices = @transform_7, window_bounds = array<i64: 2, 128>}]} {
    %c0 = arith.constant 0 : index
    %c0_0 = arith.constant 0 : index
    %0 = vector.load %arg1[%c0, %c0_0] : memref<2x143xf32, #tpu.memory_space<vmem>>, vector<2x143xf32>
    %c0_1 = arith.constant 0 : index
    %c0_2 = arith.constant 0 : index
    %1 = vector.load %arg2[%c0_1, %c0_2] : memref<143x256xf32, #tpu.memory_space<vmem>>, vector<143x256xf32>
    %cst = arith.constant dense<0.000000e+00> : vector<2x256xf32>
    %2 = tpu.matmul %0, %1, %cst {dimension_numbers = #tpu.dot_dimension_numbers<[1], [0], [0], [1], [0, 0, 1, 1], [], []>} : vector<2x143xf32>, vector<143x256xf32>, vector<2x256xf32> -> vector<2x256xf32>
    %c0_3 = arith.constant 0 : index
    %c0_4 = arith.constant 0 : index
    %3 = vector.load %arg3[%c0_3, %c0_4] : memref<1x256xf32, #tpu.memory_space<vmem>>, vector<1x256xf32>
    %4 = vector.broadcast %3 : vector<1x256xf32> to vector<2x256xf32>
    %5 = arith.addf %2, %4 : vector<2x256xf32>
    %cst_5 = arith.constant 0.000000e+00 : f32
    %6 = vector.broadcast %cst_5 : f32 to vector<2x256xf32>
    %7 = arith.maximumf %5, %6 : vector<2x256xf32>
    %c0_6 = arith.constant 0 : index
    %c0_7 = arith.constant 0 : index
    %8 = vector.load %arg4[%c0_6, %c0_7] : memref<256x128xf32, #tpu.memory_space<vmem>>, vector<256x128xf32>
    %cst_8 = arith.constant dense<0.000000e+00> : vector<2x128xf32>
    %9 = tpu.matmul %7, %8, %cst_8 {dimension_numbers = #tpu.dot_dimension_numbers<[1], [0], [0], [1], [0, 0, 1, 1], [], []>} : vector<2x256xf32>, vector<256x128xf32>, vector<2x128xf32> -> vector<2x128xf32>
    %c0_9 = arith.constant 0 : index
    %c0_10 = arith.constant 0 : index
    %10 = vector.load %arg5[%c0_9, %c0_10] : memref<1x128xf32, #tpu.memory_space<vmem>>, vector<1x128xf32>
    %11 = vector.broadcast %10 : vector<1x128xf32> to vector<2x128xf32>
    %12 = arith.addf %9, %11 : vector<2x128xf32>
    %cst_11 = arith.constant 0.000000e+00 : f32
    %13 = vector.broadcast %cst_11 : f32 to vector<2x128xf32>
    %14 = arith.maximumf %12, %13 : vector<2x128xf32>
    %c0_12 = arith.constant 0 : index
    %c0_13 = arith.constant 0 : index
    %15 = vector.load %arg6[%c0_12, %c0_13] : memref<128x128xf32, #tpu.memory_space<vmem>>, vector<128x128xf32>
    %cst_14 = arith.constant dense<0.000000e+00> : vector<2x128xf32>
    %16 = tpu.matmul %14, %15, %cst_14 {dimension_numbers = #tpu.dot_dimension_numbers<[1], [0], [0], [1], [0, 0, 1, 1], [], []>} : vector<2x128xf32>, vector<128x128xf32>, vector<2x128xf32> -> vector<2x128xf32>
    %c0_15 = arith.constant 0 : index
    %c0_16 = arith.constant 0 : index
    %17 = vector.load %arg7[%c0_15, %c0_16] : memref<1x128xf32, #tpu.memory_space<vmem>>, vector<1x128xf32>
    %18 = vector.broadcast %17 : vector<1x128xf32> to vector<2x128xf32>
    %19 = arith.addf %16, %18 : vector<2x128xf32>
    %c0_17 = arith.constant 0 : index
    %c0_18 = arith.constant 0 : index
    %20 = vector.load %arg8[%c0_17, %c0_18] : memref<2x128xf32, #tpu.memory_space<vmem>>, vector<2x128xf32>
    tpu.vector_store %arg8[%c0_17, %c0_18], %19 {strides = array<i32>} : memref<2x128xf32, #tpu.memory_space<vmem>>, vector<2x128xf32>,
    return
  }
  func.func @transform_0(%arg0: i32) -> (i32, i32) {
    %c0_i32 = arith.constant 0 : i32
    %c0_i32_0 = arith.constant 0 : i32
    return %arg0, %c0_i32 : i32, i32
  }
  func.func @transform_1(%arg0: i32) -> (i32, i32) {
    %c0_i32 = arith.constant 0 : i32
    %c0_i32_0 = arith.constant 0 : i32
    %c0_i32_1 = arith.constant 0 : i32
    return %c0_i32, %c0_i32_0 : i32, i32
  }
  func.func @transform_2(%arg0: i32) -> (i32, i32) {
    %c0_i32 = arith.constant 0 : i32
    %c0_i32_0 = arith.constant 0 : i32
    %c0_i32_1 = arith.constant 0 : i32
    return %c0_i32, %c0_i32_0 : i32, i32
  }
  func.func @transform_3(%arg0: i32) -> (i32, i32) {
    %c0_i32 = arith.constant 0 : i32
    %c0_i32_0 = arith.constant 0 : i32
    %c0_i32_1 = arith.constant 0 : i32
    return %c0_i32, %c0_i32_0 : i32, i32
  }
  func.func @transform_4(%arg0: i32) -> (i32, i32) {
    %c0_i32 = arith.constant 0 : i32
    %c0_i32_0 = arith.constant 0 : i32
    %c0_i32_1 = arith.constant 0 : i32
    return %c0_i32, %c0_i32_0 : i32, i32
  }
  func.func @transform_5(%arg0: i32) -> (i32, i32) {
    %c0_i32 = arith.constant 0 : i32
    %c0_i32_0 = arith.constant 0 : i32
    %c0_i32_1 = arith.constant 0 : i32
    return %c0_i32, %c0_i32_0 : i32, i32
  }
  func.func @transform_6(%arg0: i32) -> (i32, i32) {
    %c0_i32 = arith.constant 0 : i32
    %c0_i32_0 = arith.constant 0 : i32
    %c0_i32_1 = arith.constant 0 : i32
    return %c0_i32, %c0_i32_0 : i32, i32
  }
  func.func @transform_7(%arg0: i32) -> (i32, i32) {
    %c0_i32 = arith.constant 0 : i32
    %c0_i32_0 = arith.constant 0 : i32
    return %arg0, %c0_i32 : i32, i32
  }
}

</mosaic_0001>

<bundles_post_ra>
// kernel: age_classify_forward.1
= control target key start
LH: loop header
LB: loop body
LE: loop exit
PB: predicated region body
PF: predicated region fallthrough
CT: control target
= control target key end

     0   :  { %12 = vsyncpa [#allocation3], 0  ;;  %s847_s0 = inlined_call_operand.vmem [shape: f32[2,143], index: 0, kind: input, shape index: {}]   ;;  %s848_s1 = inlined_call_operand.hbm [shape: f32[143,256], index: 1, kind: input, shape index: {}]   ;;  %s849_s2 = inlined_call_operand.vmem [shape: f32[1,256], index: 2, kind: input, shape index: {}]   ;;  %s850_s3 = inlined_call_operand.hbm [shape: f32[256,128], index: 3, kind: input, shape index: {}]   ;;  %s851_s4 = inlined_call_operand.vmem [shape: f32[1,128], index: 4, kind: input, shape index: {}]   ;;  %s852_s5 = inlined_call_operand.hbm [shape: f32[128,128], index: 5, kind: input, shape index: {}]   ;;  %s853_s6 = inlined_call_operand.vmem [shape: f32[1,128], index: 6, kind: input, shape index: {}]   ;;  %s854_s7 = inlined_call_operand.hbm [shape: f32[2,128], index: 7, kind: output, shape index: {}]  }
   0x1   :  { %13 = vsyncpa [#allocation6], 0 }
   0x2   :  { %14 = vsyncpa [#allocation4], 0  ;;  %s723_s24 = smov [#allocation5]   ;;  %s629_s28 = scalar_lea.hbm %s850_s3, 4096 }
   0x3   :  { %s36_s25 = sshll.u32 %s723_s24, 4  ;;  %p630_p0 = scmp.ne.s32.totalorder %s850_s3, %s629_s28  ;;  %s37_s25 = int_to_ptr.vmem [resolvable:$true] %s36_s25 }
   0x4   :  { %p633_p1 = scmp.lt.u32.totalorder %s629_s28, %s850_s3 }
   0x6   :  { %p635_p2 = pnand %p633_p1, %p630_p0 }
   0x8   :  { %638 = shalt.err (!%p635_p2)
}
   0x9   :  { %s639_s10 = scalar_lea.vmem %s37_s25, 4096  ;;  %p644_p4 = scmp.lt.s32.totalorder %s37_s25, %s37_s25 }
   0xa   :  { %p640_p3 = scmp.ne.s32.totalorder %s37_s25, %s639_s10  ;;  %p645_p5 = scmp.lt.s32.totalorder %s639_s10, %s639_s10 }
   0xc   :  { %p646_p6 = por %p645_p5, %p644_p4 }
   0xe   :  { %p647_p7 = pnand %p646_p6, %p640_p3 }
  0x10   :  { %650 = shalt.err (!%p647_p7)
}
  0x11   :  { %s724_s11 = smov 128   ;;  %s725_s12 = smov 8  }
  0x12   :  { %42 = dma.hbm_to_vmem [thread:$0]  %s850_s3, 4096, %s37_s25, [#allocation6], %s724_s11, %s724_s11, %s725_s12  }
  0x13   :  { %s726_s15 = smov [#allocation2]   ;;  %s651_s19 = scalar_lea.hbm %s848_s1, 4608 }
  0x14   :  { %s22_s16 = sshll.u32 %s726_s15, 4  ;;  %p652_p8 = scmp.ne.s32.totalorder %s848_s1, %s651_s19  ;;  %s23_s16 = int_to_ptr.vmem [resolvable:$true] %s22_s16 }
  0x15   :  { %p655_p9 = scmp.lt.u32.totalorder %s651_s19, %s848_s1 }
  0x17   :  { %p657_p10 = pnand %p655_p9, %p652_p8 }
  0x19   :  { %660 = shalt.err (!%p657_p10)
}
  0x1a   :  { %s661_s24 = scalar_lea.vmem %s23_s16, 4608  ;;  %p666_p12 = scmp.lt.s32.totalorder %s23_s16, %s23_s16 }
  0x1b   :  { %p662_p11 = scmp.ne.s32.totalorder %s23_s16, %s661_s24  ;;  %p667_p13 = scmp.lt.s32.totalorder %s661_s24, %s661_s24 }
  0x1d   :  { %p668_p0 = por %p667_p13, %p666_p12 }
  0x1f   :  { %p669_p1 = pnand %p668_p0, %p662_p11 }
  0x21   :  { %672 = shalt.err (!%p669_p1)
}
  0x22   :  { %s727_s3 = smov 256   ;;  %s728_s25 = smov 16  }
  0x23   :  { %28 = dma.hbm_to_vmem [thread:$0]  %s848_s1, 4608, %s23_s16, [#allocation3], %s727_s3, %s727_s3, %s728_s25  }
  0x24   :  { %s729_s28 = smov [#allocation7]   ;;  %s673_s9 = scalar_lea.hbm %s852_s5, 2048 }
  0x25   :  { %s50_s29 = sshll.u32 %s729_s28, 4  ;;  %p674_p2 = scmp.ne.s32.totalorder %s852_s5, %s673_s9  ;;  %s51_s29 = int_to_ptr.vmem [resolvable:$true] %s50_s29 }
  0x26   :  { %p677_p3 = scmp.lt.u32.totalorder %s673_s9, %s852_s5 }
  0x28   :  { %p679_p4 = pnand %p677_p3, %p674_p2 }
  0x2a   :  { %682 = shalt.err (!%p679_p4)
}
  0x2b   :  { %s683_s17 = scalar_lea.vmem %s51_s29, 2048  ;;  %p688_p6 = scmp.lt.s32.totalorder %s51_s29, %s51_s29 }
  0x2c   :  { %p684_p5 = scmp.ne.s32.totalorder %s51_s29, %s683_s17  ;;  %p689_p7 = scmp.lt.s32.totalorder %s683_s17, %s683_s17 }
  0x2e   :  { %p690_p8 = por %p689_p7, %p688_p6 }
  0x30   :  { %p691_p9 = pnand %p690_p8, %p684_p5 }
  0x32   :  { %694 = shalt.err (!%p691_p9)
}
  0x33   :  { %56 = dma.hbm_to_vmem [thread:$0]  %s852_s5, 2048, %s51_s29, [#allocation6], %s724_s11, %s724_s11, %s725_s12  }
  0x34   :  { %717 = dma.done.wait [#allocation3], 4608  }
  0x35   :  { %718 = vsyncadd [#allocation3], 4294962688 }
  0x36   :  { %719 = dma.done.wait [#allocation6], 6144  }
  0x37   :  { %720 = vsyncadd [#allocation6], 4294961152  ;;  %v70_v0 = vld [vmem:[#allocation2 + $0x8] sm:$0xff]  ;;  %v72_v1 = vld [vmem:[#allocation2 + $0x18] sm:$0xff]  ;;  %vm127_vm0 = vcmask 121856   ;;  %vm130_vm1 = vcmask 1046528  }
  0x38   :  { %v69_v2 = vld [vmem:[#allocation2] sm:$0xff]  ;;  %v523_v3 = vpack.c.bf16 %v72_v1, %v70_v0  ;;  %v71_v4 = vld [vmem:[#allocation2 + $0x10] sm:$0xff]  ;;  %v74_v5 = vld [vmem:[#allocation2 + $0x28] sm:$0xff]  ;;  %vm730_vm2 = vmmov 1   ;;  %vm732_vm4 = vmmov 0   ;;  %s734_s21 = smov [#allocation8]  }
  0x39   :  { %v76_v6 = vld [vmem:[#allocation2 + $0x38] sm:$0xff]  ;;  %v525_v7 = vpack.c.bf16 %v71_v4, %v69_v2  ;;  %v73_v9 = vld [vmem:[#allocation2 + $0x20] sm:$0xff]  ;;  %v75_v10 = vld [vmem:[#allocation2 + $0x30] sm:$0xff]  ;;  %s420_s22 = sshll.u32 %s734_s21, 4  ;;  %s421_s22 = int_to_ptr.vmem [resolvable:$true] %s420_s22 }
  0x3a   :  { %v527_v8 = vpack.c.bf16 %v76_v6, %v74_v5  ;;  %v78_v11 = vld [vmem:[#allocation2 + $0x48] sm:$0xff]  ;;  %524 = vmatprep.subr.bf16.mxu0 %v523_v3  ;;  %v80_v12 = vld [vmem:[#allocation2 + $0x58] sm:$0xff]  ;;  %v529_v13 = vpack.c.bf16 %v75_v10, %v73_v9  ;;  %v77_v15 = vld [vmem:[#allocation2 + $0x40] sm:$0xff]  ;;  %s695_s23 = scalar_lea.vmem %s421_s22, 32  ;;  %p700_p11 = scmp.lt.s32.totalorder %s421_s22, %s421_s22 }
  0x3b   :  { %526 = vmatpush1.bf16.msra.mxu0 %v525_v7  ;;  %v531_v14 = vpack.c.bf16 %v80_v12, %v78_v11  ;;  %v79_v16 = vld [vmem:[#allocation2 + $0x50] sm:$0xff]  ;;  %v82_v17 = vld [vmem:[#allocation2 + $0x68] sm:$0xff]  ;;  %v84_v18 = vld [vmem:[#allocation2 + $0x78] sm:$0xff]  ;;  %p696_p10 = scmp.ne.s32.totalorder %s421_s22, %s695_s23  ;;  %p701_p12 = scmp.lt.s32.totalorder %s695_s23, %s695_s23 }
  0x3c   :  { %528 = vmatprep.subr.bf16.mxu0 %v527_v8  ;;  %v533_v19 = vpack.c.bf16 %v79_v16, %v77_v15  ;;  %v535_v20 = vpack.c.bf16 %v84_v18, %v82_v17  ;;  %v81_v21 = vld [vmem:[#allocation2 + $0x60] sm:$0xff]  ;;  %v83_v22 = vld [vmem:[#allocation2 + $0x70] sm:$0xff]  ;;  %v86_v23 = vld [vmem:[#allocation2 + $0x88] sm:$0xff] }
  0x3d   :  { %v88_v24 = vld [vmem:[#allocation2 + $0x98] sm:$0xff]  ;;  %v85_v25 = vld [vmem:[#allocation2 + $0x80] sm:$0xff]  ;;  %v87_v26 = vld [vmem:[#allocation2 + $0x90] sm:$0xff]  ;;  %v537_v27 = vpack.c.bf16 %v83_v22, %v81_v21  ;;  %p702_p13 = por %p701_p12, %p700_p11 }
  0x3e   :  { %v90_v28 = vld [vmem:[#allocation2 + $0xa8] sm:$0xff]  ;;  %v92_v29 = vld [vmem:[#allocation2 + $0xb8] sm:$0xff]  ;;  %v820_v30 = vld.sshfl [vmem:[%s847_s0] sm:$0x33 pattern:$0x76325410]  ;;  %v539_v33 = vpack.c.bf16 %v88_v24, %v86_v23  ;;  %v541_v46 = vpack.c.bf16 %v87_v26, %v85_v25 }
  0x3f   :  { %530 = vmatpush1.bf16.msra.mxu0 %v529_v13  ;;  %v226_v31 = vld [vmem:[#allocation5 + $0x80] sm:$0xff]  ;;  %v227_v32 = vld [vmem:[#allocation5 + $0x88] sm:$0xff]  ;;  %v125_v34 = vcombine.high %v820_v30, %v820_v30  ;;  %v228_v38 = vld [vmem:[#allocation5 + $0x90] sm:$0xff]  ;;  %v543_v50 = vpack.c.bf16 %v92_v29, %v90_v28  ;;  %p703_p0 = pnand %p702_p13, %p696_p10 }
  0x40   :  { %532 = vmatprep.subr.bf16.mxu0 %v531_v14  ;;  %v561_v35 = vpack.c.bf16 %v227_v32, %v226_v31  ;;  %v210_v36 = vld [vmem:[#allocation5] sm:$0xff]  ;;  %v211_v37 = vld [vmem:[#allocation5 + $0x8] sm:$0xff]  ;;  %v229_v40 = vld [vmem:[#allocation5 + $0x98] sm:$0xff] }
  0x41   :  { %v563_v39 = vpack.c.bf16 %v211_v37, %v210_v36  ;;  %v212_v41 = vld [vmem:[#allocation5 + $0x10] sm:$0xff]  ;;  %v213_v42 = vld [vmem:[#allocation5 + $0x18] sm:$0xff]  ;;  %433 = vmatprep.mubr.msk.f32.mxu0 %vm127_vm0, %v125_v34  ;;  %v565_v43 = vpack.c.bf16 %v229_v40, %v228_v38  ;;  %v230_v44 = vld [vmem:[#allocation5 + $0xa0] sm:$0xff] }
  0x42   :  { %562 = vmatprep.subr.bf16.mxu1 %v561_v35  ;;  %v231_v45 = vld [vmem:[#allocation5 + $0xa8] sm:$0xff]  ;;  %v89_v47 = vld [vmem:[#allocation2 + $0xa0] sm:$0xff]  ;;  %v91_v48 = vld [vmem:[#allocation2 + $0xb0] sm:$0xff]  ;;  %v567_v49 = vpack.c.bf16 %v213_v42, %v212_v41  ;;  %v731_v41 = vmov 0.0|0.0   ;;  %v107_v42 = vlaneseq }
  0x43   :  { %534 = vmatpush1.bf16.msra.mxu0 %v533_v19  ;;  %564 = vmatpush3.bf16.msra.mxu1 %v563_v39  ;;  %v94_v51 = vld [vmem:[#allocation2 + $0xc8] sm:$0xff]  ;;  %v569_v52 = vpack.c.bf16 %v231_v45, %v230_v44  ;;  %v214_v53 = vld [vmem:[#allocation5 + $0x20] sm:$0xff]  ;;  %v96_v55 = vld [vmem:[#allocation2 + $0xd8] sm:$0xff]  ;;  %v545_v58 = vpack.c.bf16 %v91_v48, %v89_v47 }
  0x44   :  { %536 = vmatprep.subr.bf16.mxu0 %v535_v20  ;;  %566 = vmatprep.subr.bf16.mxu1 %v565_v43  ;;  %v215_v54 = vld [vmem:[#allocation5 + $0x28] sm:$0xff]  ;;  %v232_v56 = vld [vmem:[#allocation5 + $0xb0] sm:$0xff]  ;;  %v233_v57 = vld [vmem:[#allocation5 + $0xb8] sm:$0xff]  ;;  %v547_v62 = vpack.c.bf16 %v96_v55, %v94_v51  ;;  %v108_v43 = vshrl.u32 %v107_v42, 7 }
  0x45   :  { %v93_v59 = vld [vmem:[#allocation2 + $0xc0] sm:$0xff]  ;;  %v95_v60 = vld [vmem:[#allocation2 + $0xd0] sm:$0xff]  ;;  %v571_v61 = vpack.c.bf16 %v215_v54, %v214_v53  ;;  %v98_v63 = vld [vmem:[#allocation2 + $0xe8] sm:$0xff]  ;;  %v573_v0 = vpack.c.bf16 %v233_v57, %v232_v56 }
  0x46   :  { %v216_v1 = vld [vmem:[#allocation5 + $0x30] sm:$0xff]  ;;  %v217_v2 = vld [vmem:[#allocation5 + $0x38] sm:$0xff]  ;;  %v234_v4 = vld [vmem:[#allocation5 + $0xc0] sm:$0xff]  ;;  %v549_v6 = vpack.c.bf16 %v95_v60, %v93_v59  ;;  %v109_v44 = vsub.s32 0, %v108_v43  ;;  %v113_v45 = vsub.s32 1, %v108_v43 }
  0x47   :  { %538 = vmatpush1.bf16.msra.mxu0 %v537_v27  ;;  %568 = vmatpush3.bf16.msra.mxu1 %v567_v49  ;;  %v100_v3 = vld [vmem:[#allocation2 + $0xf8] sm:$0xff]  ;;  %v235_v5 = vld [vmem:[#allocation5 + $0xc8] sm:$0xff]  ;;  %v97_v7 = vld [vmem:[#allocation2 + $0xe0] sm:$0xff]  ;;  %v575_v9 = vpack.c.bf16 %v217_v2, %v216_v1 }
  0x48   :  { %540 = vmatprep.subr.bf16.mxu0 %v539_v33  ;;  %570 = vmatprep.subr.bf16.mxu1 %v569_v52  ;;  %v99_v8 = vld [vmem:[#allocation2 + $0xf0] sm:$0xff]  ;;  %v551_v10 = vpack.c.bf16 %v100_v3, %v98_v63  ;;  %v102_v11 = vld [vmem:[#allocation2 + $0x108] sm:$0xff]  ;;  %v577_v12 = vpack.c.bf16 %v235_v5, %v234_v4  ;;  %v218_v13 = vld [vmem:[#allocation5 + $0x40] sm:$0xff] }
  0x49   :  { %v219_v14 = vld [vmem:[#allocation5 + $0x48] sm:$0xff]  ;;  %v104_v15 = vld [vmem:[#allocation2 + $0x118] sm:$0x7f]  ;;  %v236_v16 = vld [vmem:[#allocation5 + $0xd0] sm:$0xff]  ;;  %v553_v18 = vpack.c.bf16 %v99_v8, %v97_v7 }
  0x4a   :  { %v237_v17 = vld [vmem:[#allocation5 + $0xd8] sm:$0xff]  ;;  %v101_v19 = vld [vmem:[#allocation2 + $0x100] sm:$0xff]  ;;  %v579_v20 = vpack.c.bf16 %v219_v14, %v218_v13  ;;  %v555_v21 = vpack.c.bf16 %v104_v15, %v102_v11  ;;  %v103_v22 = vld [vmem:[#allocation2 + $0x110] sm:$0x7f]  ;;  %v733_v14 = vmov 0.0  }
  0x4b   :  { %542 = vmatpush1.bf16.msra.mxu0 %v541_v46  ;;  %572 = vmatpush3.bf16.msra.mxu1 %v571_v61  ;;  %v581_v23 = vpack.c.bf16 %v237_v17, %v236_v16  ;;  %v220_v24 = vld [vmem:[#allocation5 + $0x50] sm:$0xff]  ;;  %v221_v25 = vld [vmem:[#allocation5 + $0x58] sm:$0xff]  ;;  %vm556_vm3 = vmpackc.low %vm130_vm1, %vm730_vm2  ;;  %v558_v28 = vpack.c.bf16 %v103_v22, %v101_v19 }
  0x4c   :  { %544 = vmatprep.subr.bf16.mxu0 %v543_v50  ;;  %574 = vmatprep.subr.bf16.mxu1 %v573_v0  ;;  %v238_v26 = vld [vmem:[#allocation5 + $0xe0] sm:$0xff]  ;;  %v239_v27 = vld [vmem:[#allocation5 + $0xe8] sm:$0xff]  ;;  %v583_v29 = vpack.c.bf16 %v221_v25, %v220_v24  ;;  %v240_v35 = vld [vmem:[#allocation5 + $0xf0] sm:$0xff] }
  0x4d   :  { %v585_v31 = vpack.c.bf16 %v239_v27, %v238_v26  ;;  %v222_v32 = vld [vmem:[#allocation5 + $0x60] sm:$0xff]  ;;  %v223_v33 = vld [vmem:[#allocation5 + $0x68] sm:$0xff]  ;;  %v241_v36 = vld [vmem:[#allocation5 + $0xf8] sm:$0xff] }
  0x4e   :  { %v587_v34 = vpack.c.bf16 %v223_v33, %v222_v32  ;;  %v589_v37 = vpack.c.bf16 %v241_v36, %v240_v35  ;;  %v224_v38 = vld [vmem:[#allocation5 + $0x70] sm:$0xff]  ;;  %v225_v39 = vld [vmem:[#allocation5 + $0x78] sm:$0xff]  ;;  %v320_v51 = vld [vmem:[#allocation7] sm:$0xff] }
  0x4f   :  { %546 = vmatpush1.bf16.msra.mxu0 %v545_v58  ;;  %576 = vmatpush3.bf16.msra.mxu1 %v575_v9  ;;  %v591_v40 = vpack.c.bf16 %v225_v39, %v224_v38  ;;  %v321_v52 = vld [vmem:[#allocation7 + $0x8] sm:$0xff]  ;;  %v322_v57 = vld [vmem:[#allocation7 + $0x10] sm:$0xff]  ;;  %v323_v58 = vld [vmem:[#allocation7 + $0x18] sm:$0xff] }
  0x50   :  { %548 = vmatprep.subr.bf16.mxu0 %v547_v62  ;;  %578 = vmatprep.subr.bf16.mxu1 %v577_v12  ;;  %v594_v55 = vpack.c.bf16 %v321_v52, %v320_v51  ;;  %v597_v59 = vpack.c.bf16 %v323_v58, %v322_v57  ;;  %v324_v60 = vld [vmem:[#allocation7 + $0x20] sm:$0xff]  ;;  %v325_v61 = vld [vmem:[#allocation7 + $0x28] sm:$0xff]  ;;  %v326_v63 = vld [vmem:[#allocation7 + $0x30] sm:$0xff] }
  0x51   :  { %v600_v62 = vpack.c.bf16 %v325_v61, %v324_v60  ;;  %v327_v0 = vld [vmem:[#allocation7 + $0x38] sm:$0xff]  ;;  %v328_v2 = vld [vmem:[#allocation7 + $0x40] sm:$0xff]  ;;  %v329_v3 = vld [vmem:[#allocation7 + $0x48] sm:$0xff] }
  0x52   :  { %v603_v1 = vpack.c.bf16 %v327_v0, %v326_v63  ;;  %v606_v4 = vpack.c.bf16 %v329_v3, %v328_v2  ;;  %v330_v5 = vld [vmem:[#allocation7 + $0x50] sm:$0xff]  ;;  %v332_v8 = vld [vmem:[#allocation7 + $0x60] sm:$0xff]  ;;  %v333_v9 = vld [vmem:[#allocation7 + $0x68] sm:$0xff] }
  0x53   :  { %550 = vmatpush1.bf16.msra.mxu0 %v549_v6  ;;  %580 = vmatpush3.bf16.msra.mxu1 %v579_v20  ;;  %v331_v6 = vld [vmem:[#allocation7 + $0x58] sm:$0xff]  ;;  %v334_v11 = vld [vmem:[#allocation7 + $0x70] sm:$0xff]  ;;  %v434_v16 = vld [vmem:[%s851_s4] ss:$0 sm:$0xff] }
  0x54   :  { %552 = vmatprep.subr.bf16.mxu0 %v551_v10  ;;  %582 = vmatprep.subr.bf16.mxu1 %v581_v23  ;;  %v609_v7 = vpack.c.bf16 %v331_v6, %v330_v5  ;;  %v612_v10 = vpack.c.bf16 %v333_v9, %v332_v8  ;;  %v335_v12 = vld [vmem:[#allocation7 + $0x78] sm:$0xff] }
  0x55   :  { %v615_v13 = vpack.c.bf16 %v335_v12, %v334_v11 }
  0x57   :  { %554 = vmatpush1.bf16.msra.mxu0 %v553_v18  ;;  %584 = vmatpush3.bf16.msra.mxu1 %v583_v29 }
  0x58   :  { %557 = vmatprep.subr.msk.bf16.mxu0 %vm556_vm3, %v555_v21  ;;  %586 = vmatprep.subr.bf16.mxu1 %v585_v31  ;;  %v435_v21 = vld [vmem:[%s853_s6] ss:$0 sm:$0xff] }
  0x5b   :  { %560 = vmatpush1.bf16.msk.msra.mxu0 %vm556_vm3, %v558_v28  ;;  %588 = vmatpush3.bf16.msra.mxu1 %v587_v34 }
  0x5c   :  { %590 = vmatprep.subr.bf16.mxu1 %v589_v37 }
  0x5e   :  { %202 = vmatmul.mubr.f32.vlgmr.msra.gmra.mrb[0].mxu0 %v820_v30  ;;  %v105_v30 = vld [vmem:[%s849_s2] sm:$0x3] }
  0x5f   :  { %592 = vmatpush3.bf16.msra.mxu1 %v591_v40  ;;  %v110_v46 = vrot.slane %v105_v30, %v109_v44  ;;  %v114_v47 = vrot.slane %v105_v30, %v113_v45 }
  0x60   :  { %593 = vmatprep.subr.bf16.mxu1 %v731_v41 }
 0x131   :  { %v203_v48 = vpop.f32.mrb[0].mxu0 }
 0x132   :  { %v204_v49 = vadd.f32 %v203_v48, %v110_v46  ;;  %v205_v50 = vpop.f32.mrb[1].mxu0 }
 0x133   :  { %v206_v53 = vadd.f32 %v205_v50, %v114_v47 }
 0x134   :  { %v208_v56 = vmax.f32 %v204_v49, 0.0 }
 0x135   :  { %v209_v54 = vmax.f32 %v206_v53, 0.0 }
 0x137   :  { %313 = vmatprep.mubr.f32.mxu1 %v209_v54 }
 0x138   :  { %314 = vmatmul.mubr.f32.vlgmr.msra.gmra.mrb[0].mxu1 %v208_v56 }
 0x139   :  { %595 = vmatpush3.bf16.msra.mxu1 %v594_v55  ;;  %520 = vmatprep.mubr.msk.f32.mxu1 %vm732_vm4, %v733_v14 }
 0x13a   :  { %596 = vmatprep.subr.bf16.mxu1 %v731_v41 }
 0x13d   :  { %598 = vmatpush3.bf16.msra.mxu1 %v597_v59 }
 0x13e   :  { %599 = vmatprep.subr.bf16.mxu1 %v731_v41 }
 0x141   :  { %601 = vmatpush3.bf16.msra.mxu1 %v600_v62 }
 0x142   :  { %602 = vmatprep.subr.bf16.mxu1 %v731_v41 }
 0x145   :  { %604 = vmatpush3.bf16.msra.mxu1 %v603_v1 }
 0x146   :  { %605 = vmatprep.subr.bf16.mxu1 %v731_v41 }
 0x149   :  { %607 = vmatpush3.bf16.msra.mxu1 %v606_v4 }
 0x14a   :  { %608 = vmatprep.subr.bf16.mxu1 %v731_v41 }
 0x14d   :  { %610 = vmatpush3.bf16.msra.mxu1 %v609_v7 }
 0x14e   :  { %611 = vmatprep.subr.bf16.mxu1 %v731_v41 }
 0x151   :  { %613 = vmatpush3.bf16.msra.mxu1 %v612_v10 }
 0x152   :  { %614 = vmatprep.subr.bf16.mxu1 %v731_v41 }
 0x155   :  { %616 = vmatpush3.bf16.msra.mxu1 %v615_v13 }
 0x20b   :  { %v468_v15 = vpop.f32.mrb[0].mxu1 }
 0x20c   :  { %v469_v17 = vpop.f32.mrb[1].mxu1 }
 0x20d   :  { %v470_v18 = vadd.f32 %v469_v17, %v468_v15 }
 0x20f   :  { %v316_v19 = vadd.f32 %v470_v18, %v434_v16 }
 0x211   :  { %v319_v20 = vmax.f32 %v316_v19, 0.0 }
 0x213   :  { %521 = vmatmul.mubr.f32.vlgmr.msra.gmra.mrb[2].mxu1 %v319_v20 }
 0x2e6   :  { %v409_v22 = vpop.f32.mrb[2].mxu1 }
 0x2e7   :  { %v410_v23 = vadd.f32 %v435_v21, %v409_v22  ;;  %v522_v24 = vpop.f32.mrb[3].mxu1 }
 0x2e9   :  { %413 = vst [vmem:[#allocation8] sm:$0x3] %v410_v23 }
 0x2ea   :  { %706 = shalt.err (!%p703_p0)
}
 0x2eb   :  { %s707_s3 = scalar_lea.hbm %s854_s7, 32 }
 0x2ec   :  { %p708_p1 = scmp.ne.s32.totalorder %s854_s7, %s707_s3  ;;  %p711_p2 = scmp.lt.u32.totalorder %s707_s3, %s854_s7 }
 0x2ee   :  { %p713_p3 = pnand %p711_p2, %p708_p1 }
 0x2f0   :  { %716 = shalt.err (!%p713_p3)
}
 0x2f1   :  { %423 = dma.vmem_to_hbm [thread:$0]  %s421_s22, 32, %s854_s7, [#allocation4]  }
 0x2f2   :  { %721 = dma.done.wait [#allocation4], 32  }
 0x2f3   :  { %722 = vsyncadd [#allocation4], 4294967264 }
 0x2f4   :  { %427 = vsyncpa [#allocation3], 1 }
 0x2f5   :  { %428 = vsyncpa [#allocation6], 1 }
 0x2f6   :  { %429 = vsyncpa [#allocation4], 1 }

</bundles_post_ra>
